<compile_context>
chip_gen: v5e
topology: v5e:2x2
jax: 0.10.0
libtpu: 0.0.40
codegen_flags: <defaults>
</compile_context>

<pallas_src>
import jax
import jax.numpy as jnp
from jax.experimental import pallas as pl
from jax.experimental.pallas import tpu as pltpu


def _bn_gelu_kernel(x_ref, scale_ref, shift_ref, o_ref):
    # x_ref:     (TILE_R, TILE_C) tile of the 2-D view.
    # scale_ref: (TILE_R, 1) or (1, TILE_C) f32 — folded BN scale * 1/sqrt(2).
    # shift_ref: same shape as scale_ref      — folded BN shift * 1/sqrt(2).
    x = x_ref[...].astype(jnp.float32)
    z = x * scale_ref[...] + shift_ref[...]            # z = y / sqrt(2)
    inv_sqrt2 = jnp.float32(0.7071067811865476)
    out = inv_sqrt2 * z * (1.0 + jax.lax.erf(z))        # == 0.5*y*(1+erf(y/sqrt2))
    o_ref[...] = out.astype(o_ref.dtype)


def _choose_tiles(rows, cols, itemsize, target_bytes=2 * 1024 * 1024):
    """Pick (tile_r, tile_c) for a (rows, cols) elementwise kernel.

    Goals: ~target_bytes per input tile (amortize the ~0.35 us/step overhead,
    run near the HBM roofline), full-width lane tiles whenever they fit the
    budget (contiguous HBM DMA, no small strided per-row chunks), and block
    dims that are multiples of (8, 128) or equal to the full array extent.
    """
    max_elems = max(8 * 128, target_bytes // itemsize)

    if cols * min(rows, 8) <= max_elems:
        # Full-width tiles fit the byte budget -> contiguous DMA per block.
        tile_c = cols
        if rows <= 8:
            tile_r = rows
        else:
            tile_r = max(8, (max_elems // cols // 8) * 8)
            if tile_r >= rows:
                tile_r = rows
    else:
        # A full-width tile would blow the budget: take the widest
        # multiple-of-128 lane tile that fits, with minimal sublane depth.
        tile_r = rows if rows < 8 else 8
        tile_c = max(128, (max_elems // tile_r // 128) * 128)
    return tile_r, tile_c


def bn_gelu(x_nchw, gamma, beta, running_mean, running_var, *, eps=1e-3):
    """BNGeLU forward. x_nchw: (N, C, H, W). Returns (N, C, H, W)."""
    N, C, H, W = x_nchw.shape
    dtype = x_nchw.dtype
    HW = H * W
    itemsize = jnp.dtype(dtype).itemsize

    inv_sqrt2 = jnp.float32(0.7071067811865476)
    scale_c = gamma.astype(jnp.float32) / jnp.sqrt(
        running_var.astype(jnp.float32) + jnp.float32(eps))
    shift_c = beta.astype(jnp.float32) - running_mean.astype(jnp.float32) * scale_c
    # Fold GELU's 1/sqrt(2) into the affine: one less full-tile multiply in-kernel.
    scale_c = scale_c * inv_sqrt2
    shift_c = shift_c * inv_sqrt2

    if HW >= 128:
        # Spatial axis on lanes; per-(n, c) scale/shift broadcast along lanes.
        rows, cols = N * C, HW
        x2d = x_nchw.reshape(rows, cols)
        scale = jnp.tile(scale_c, (N,)).reshape(rows, 1)
        shift = jnp.tile(shift_c, (N,)).reshape(rows, 1)
        row_varying = True
    else:
        # Small spatial dims: fold C into the lane axis so blocks/stores stay
        # lane-dense; scale/shift vary along lanes (repeat each channel HW x).
        rows, cols = N, C * HW
        x2d = x_nchw.reshape(rows, cols)
        scale = jnp.repeat(scale_c, HW).reshape(1, cols)
        shift = jnp.repeat(shift_c, HW).reshape(1, cols)
        row_varying = False

    tile_r, tile_c = _choose_tiles(rows, cols, itemsize)

    # v7x megacore: for >=1 MiB tensors make sure there are >=2 blocks along a
    # "parallel" axis so both TensorCores get work (no-op on 1-TC v5e/v6e).
    total_bytes = rows * cols * itemsize
    if total_bytes >= (1 << 20) and pl.cdiv(rows, tile_r) * pl.cdiv(cols, tile_c) < 2:
        if rows >= 16:
            tile_r = max(8, ((rows // 2 + 7) // 8) * 8)
        elif cols >= 256:
            tile_c = max(128, ((cols // 2 + 127) // 128) * 128)

    grid = (pl.cdiv(rows, tile_r), pl.cdiv(cols, tile_c))

    if row_varying:
        param_spec = pl.BlockSpec((tile_r, 1), lambda i, j: (i, 0))
    else:
        param_spec = pl.BlockSpec((1, tile_c), lambda i, j: (0, j))

    out2d = pl.pallas_call(
        _bn_gelu_kernel,
        out_shape=jax.ShapeDtypeStruct((rows, cols), dtype),
        grid_spec=pltpu.PrefetchScalarGridSpec(
            num_scalar_prefetch=0,
            grid=grid,
            in_specs=[
                pl.BlockSpec((tile_r, tile_c), lambda i, j: (i, j)),  # x tile
                param_spec,                                           # scale
                param_spec,                                           # shift
            ],
            out_specs=pl.BlockSpec((tile_r, tile_c), lambda i, j: (i, j)),
        ),
        compiler_params=pltpu.CompilerParams(
            dimension_semantics=("parallel", "parallel"),
            # Safe on every generation: <=48 MiB scoped (v7x has 64 MiB/TC,
            # v5e/v6e have 128 MiB); actual footprint is ~8-16 MiB.
            vmem_limit_bytes=48 * 1024 * 1024,
        ),
    )(x2d, scale, shift)

    return out2d.reshape(N, C, H, W)   # free reshape back to NCHW


def bn_gelu_reference(x_nchw, gamma, beta, running_mean, running_var, eps=1e-3):
    # Pure-JAX reference: eval-mode BN + exact erf GELU, NCHW broadcasting.
    g = gamma.reshape(1, -1, 1, 1)
    b = beta.reshape(1, -1, 1, 1)
    m = running_mean.reshape(1, -1, 1, 1)
    v = running_var.reshape(1, -1, 1, 1)
    y = g * (x_nchw - m) / jnp.sqrt(v + eps) + b
    return 0.5 * y * (1.0 + jax.lax.erf(y / jnp.sqrt(2.0).astype(y.dtype)))


def _make_inputs(key, N, C, H, W):
    k_x, k_g, k_b, k_m, k_v = jax.random.split(key, 5)
    x = jax.random.normal(k_x, (N, C, H, W), dtype=jnp.float32)
    gamma = 1.0 + 0.1 * jax.random.normal(k_g, (C,), dtype=jnp.float32)
    beta = 0.1 * jax.random.normal(k_b, (C,), dtype=jnp.float32)
    running_mean = 0.05 * jax.random.normal(k_m, (C,), dtype=jnp.float32)
    running_var = 1.0 + 0.1 * jax.random.uniform(k_v, (C,), dtype=jnp.float32)
    return x, gamma, beta, running_mean, running_var


if __name__ == "__main__":
    key = jax.random.PRNGKey(0)
    k1, k2 = jax.random.split(key)

    # Main check: H*W >= 128 path (row-varying scale/shift).
    N, C, H, W = 2, 4, 16, 16
    x, gamma, beta, rm, rv = _make_inputs(k1, N, C, H, W)
    out = jax.block_until_ready(bn_gelu(x, gamma, beta, rm, rv))
    ref = bn_gelu_reference(x, gamma, beta, rm, rv)
    assert out.shape == (N, C, H, W)
    assert jnp.allclose(out, ref, atol=1e-5, rtol=1e-5), "mismatch vs reference (HW>=128 path)"

    # Secondary check: small-spatial (H*W < 128) lane-folded path.
    N2, C2, H2, W2 = 2, 8, 4, 4
    x2, g2, b2, rm2, rv2 = _make_inputs(k2, N2, C2, H2, W2)
    out2 = jax.block_until_ready(bn_gelu(x2, g2, b2, rm2, rv2))
    ref2 = bn_gelu_reference(x2, g2, b2, rm2, rv2)
    assert out2.shape == (N2, C2, H2, W2)
    assert jnp.allclose(out2, ref2, atol=1e-5, rtol=1e-5), "mismatch vs reference (HW<128 path)"

    print("KERNEL_OK")
</pallas_src>

<mosaic_0001>
module attributes {stable_mosaic.version = 11 : i64} {
  func.func @_bn_gelu_kernel(%arg0: i32, %arg1: i32, %arg2: memref<8x256xf32, #tpu.memory_space<vmem>>, %arg3: memref<8x1xf32, #tpu.memory_space<vmem>>, %arg4: memref<8x1xf32, #tpu.memory_space<vmem>>, %arg5: memref<8x256xf32, #tpu.memory_space<vmem>>) attributes {dimension_semantics = [#tpu.dimension_semantics<parallel>, #tpu.dimension_semantics<parallel>], iteration_bounds = array<i64: 1, 1>, scalar_prefetch = 0 : i64, scratch_operands = 0 : i64, tpu.core_type = #tpu.core_type<tc>, window_params = [{transform_indices = @transform_0, window_bounds = array<i64: 8, 256>}, {transform_indices = @transform_1, window_bounds = array<i64: 8, 1>}, {transform_indices = @transform_2, window_bounds = array<i64: 8, 1>}, {transform_indices = @transform_3, window_bounds = array<i64: 8, 256>}]} {
    %c0 = arith.constant 0 : index
    %c0_0 = arith.constant 0 : index
    %0 = vector.load %arg2[%c0, %c0_0] : memref<8x256xf32, #tpu.memory_space<vmem>>, vector<8x256xf32>
    %c0_1 = arith.constant 0 : index
    %c0_2 = arith.constant 0 : index
    %1 = vector.load %arg3[%c0_1, %c0_2] : memref<8x1xf32, #tpu.memory_space<vmem>>, vector<8x1xf32>
    %2 = vector.broadcast %1 : vector<8x1xf32> to vector<8x256xf32>
    %3 = arith.mulf %0, %2 : vector<8x256xf32>
    %c0_3 = arith.constant 0 : index
    %c0_4 = arith.constant 0 : index
    %4 = vector.load %arg4[%c0_3, %c0_4] : memref<8x1xf32, #tpu.memory_space<vmem>>, vector<8x1xf32>
    %5 = vector.broadcast %4 : vector<8x1xf32> to vector<8x256xf32>
    %6 = arith.addf %3, %5 : vector<8x256xf32>
    %cst = arith.constant 0.707106769 : f32
    %7 = vector.broadcast %cst : f32 to vector<8x256xf32>
    %8 = arith.mulf %7, %6 : vector<8x256xf32>
    %9 = math.erf %6 : vector<8x256xf32>
    %cst_5 = arith.constant 1.000000e+00 : f32
    %10 = vector.broadcast %cst_5 : f32 to vector<8x256xf32>
    %11 = arith.addf %10, %9 : vector<8x256xf32>
    %12 = arith.mulf %8, %11 : vector<8x256xf32>
    %c0_6 = arith.constant 0 : index
    %c0_7 = arith.constant 0 : index
    %13 = vector.load %arg5[%c0_6, %c0_7] : memref<8x256xf32, #tpu.memory_space<vmem>>, vector<8x256xf32>
    tpu.vector_store %arg5[%c0_6, %c0_7], %12 {strides = array<i32>} : memref<8x256xf32, #tpu.memory_space<vmem>>, vector<8x256xf32>,
    return
  }
  func.func @transform_0(%arg0: i32, %arg1: i32) -> (i32, i32) {
    %c0_i32 = arith.constant 0 : i32
    return %arg0, %arg1 : i32, i32
  }
  func.func @transform_1(%arg0: i32, %arg1: i32) -> (i32, i32) {
    %c0_i32 = arith.constant 0 : i32
    %c0_i32_0 = arith.constant 0 : i32
    return %arg0, %c0_i32 : i32, i32
  }
  func.func @transform_2(%arg0: i32, %arg1: i32) -> (i32, i32) {
    %c0_i32 = arith.constant 0 : i32
    %c0_i32_0 = arith.constant 0 : i32
    return %arg0, %c0_i32 : i32, i32
  }
  func.func @transform_3(%arg0: i32, %arg1: i32) -> (i32, i32) {
    %c0_i32 = arith.constant 0 : i32
    return %arg0, %arg1 : i32, i32
  }
}

</mosaic_0001>

<bundles_post_ra>
// kernel: tpu_custom_call.1
= control target key start
LH: loop header
LB: loop body
LE: loop exit
PB: predicated region body
PF: predicated region fallthrough
CT: control target
= control target key end

     0   :  { %s221_s0 = inlined_call_operand.vmem [shape: f32[8,256], index: 0, kind: input, shape index: {}]   ;;  %s222_s1 = inlined_call_operand.vmem [shape: f32[8,1], index: 1, kind: input, shape index: {}]   ;;  %s223_s2 = inlined_call_operand.vmem [shape: f32[8,1], index: 2, kind: input, shape index: {}]   ;;  %s224_s3 = inlined_call_operand.hbm [shape: f32[8,256], index: 3, kind: output, shape index: {}]  }
   0x1   :  { %v17_v0 = vld [vmem:[%s222_s1] sm:$0xff] }
   0x2   :  { %8 = vsyncpa [#allocation3], 0  ;;  %v172_v1 = vmov 0   ;;  %v25_v2 = vld [vmem:[%s223_s2] sm:$0xff]  ;;  %v16_v5 = vld [vmem:[%s221_s0 + $0x8] sm:$0xff]  ;;  %s128_s21 = sshll.u32 %s224_s3, 4  ;;  %s129_s21 = int_to_ptr.hbm [resolvable:$true] %s128_s21 }
   0x3   :  { %141 = vset.pattern.permute.xlu0 %v172_v1  ;;  %v15_v4 = vld [vmem:[%s221_s0] sm:$0xff]  ;;  %s173_s0 = smov [#allocation2]  }
   0x4   :  { %20 = vperm.xlu0 %141, %v17_v0   ;;  %s126_s1 = sshll.u32 %s173_s0, 4  ;;  %s127_s1 = int_to_ptr.vmem [resolvable:$true] %s126_s1 }
   0xc   :  { %28 = vperm.xlu0 %141, %v25_v2  }
  0x76   :  { %v21_v3 = vpop.permute.xlu0 %20 }
  0x77   :  { %v23_v6 = vmul.f32 %v21_v3, %v15_v4  ;;  %v24_v7 = vmul.f32 %v21_v3, %v16_v5 }
  0x7e   :  { %v29_v8 = vpop.permute.xlu0 %28 }
  0x7f   :  { %v206_v9 = vadd.f32 %v29_v8, %v23_v6  ;;  %v208_v10 = vadd.f32 %v29_v8, %v24_v7 }
  0x81   :  { %v35_v11 = vmul.f32 %v206_v9, %v206_v9  ;;  %v75_v12 = vmul.f32 %v208_v10, %v208_v10 }
  0x83   :  { %v36_v13 = vmin.f32 %v35_v11, 16.0  ;;  %v76_v14 = vmin.f32 %v75_v12, 16.0 }
  0x85   :  { %v37_v15 = vmul.f32 2.1237322e-06, %v36_v13  ;;  %v48_v16 = vmul.f32 3.8918573e-05, %v36_v13  ;;  %v77_v17 = vmul.f32 2.1237322e-06, %v76_v14 }
  0x86   :  { %v88_v18 = vmul.f32 3.8918573e-05, %v76_v14 }
  0x87   :  { %v38_v19 = vadd.f32 0.00028619796, %v37_v15  ;;  %v49_v20 = vadd.f32 0.001143296, %v48_v16  ;;  %v78_v21 = vadd.f32 0.00028619796, %v77_v17 }
  0x88   :  { %v89_v22 = vadd.f32 0.001143296, %v88_v18 }
  0x89   :  { %v39_v23 = vmul.f32 %v38_v19, %v36_v13  ;;  %v50_v24 = vmul.f32 %v49_v20, %v36_v13  ;;  %v79_v25 = vmul.f32 %v78_v21, %v76_v14  ;;  %v33_v19 = vmul.f32 0.70710677, %v206_v9 }
  0x8a   :  { %v90_v26 = vmul.f32 %v89_v22, %v76_v14  ;;  %v34_v21 = vmul.f32 0.70710677, %v208_v10 }
  0x8b   :  { %v40_v27 = vadd.f32 0.0036580483, %v39_v23  ;;  %v51_v28 = vadd.f32 0.014752088, %v50_v24  ;;  %v80_v31 = vadd.f32 0.0036580483, %v79_v25 }
  0x8c   :  { %v91_v29 = vadd.f32 0.014752088, %v90_v26 }
  0x8d   :  { %v52_v30 = vmul.f32 %v51_v28, %v36_v13  ;;  %v41_v33 = vmul.f32 %v40_v27, %v36_v13  ;;  %v81_v37 = vmul.f32 %v80_v31, %v76_v14 }
  0x8e   :  { %v92_v32 = vmul.f32 %v91_v29, %v76_v14 }
  0x8f   :  { %v53_v34 = vadd.f32 0.112945676, %v52_v30  ;;  %v42_v39 = vadd.f32 0.05243302, %v41_v33  ;;  %v82_v43 = vadd.f32 0.05243302, %v81_v37 }
  0x90   :  { %v93_v35 = vadd.f32 0.112945676, %v92_v32 }
  0x91   :  { %v54_v36 = vmul.f32 %v53_v34, %v36_v13  ;;  %v43_v45 = vmul.f32 %v42_v39, %v36_v13  ;;  %v83_v48 = vmul.f32 %v82_v43, %v76_v14 }
  0x92   :  { %v94_v38 = vmul.f32 %v93_v35, %v76_v14 }
  0x93   :  { %v55_v40 = vadd.f32 0.4994258, %v54_v36  ;;  %v44_v49 = vadd.f32 0.18741608, %v43_v45  ;;  %v84_v50 = vadd.f32 0.18741608, %v83_v48 }
  0x94   :  { %v95_v41 = vadd.f32 0.4994258, %v94_v38 }
  0x95   :  { %v56_v42 = vmul.f32 %v55_v40, %v36_v13  ;;  %v45_v52 = vmul.f32 %v44_v49, %v36_v13  ;;  %v85_v55 = vmul.f32 %v84_v50, %v76_v14 }
  0x96   :  { %v96_v44 = vmul.f32 %v95_v41, %v76_v14 }
  0x97   :  { %v57_v46 = vadd.f32 1.0, %v56_v42  ;;  %v46_v58 = vadd.f32 1.1283791, %v45_v52  ;;  %v86_v0 = vadd.f32 1.1283791, %v85_v55 }
  0x98   :  { %v97_v47 = vadd.f32 1.0, %v96_v44 }
  0x99   :  { %142 = vrcp.f32 %v57_v46  ;;  %v69_v59 = vand.u32 2147483648, %v57_v46  ;;  %v67_v62 = vand.u32 2147483647, %v57_v46  ;;  %vm63_vm2 = vweird.f32 %v57_v46 }
  0x9a   :  { %144 = vrcp.f32 %v97_v47  ;;  %v109_v63 = vand.u32 2147483648, %v97_v47  ;;  %v107_v2 = vand.u32 2147483647, %v97_v47  ;;  %vm103_vm4 = vweird.f32 %v97_v47 }
  0x9b   :  { %v70_v4 = vor.u32 1.1754944e-38, %v69_v59  ;;  %v47_v6 = vmul.f32 %v46_v58, %v206_v9  ;;  %vm68_vm5 = vcmp.eq.f32.partialorder %v67_v62, 8.507059e+37  ;;  %v87_v12 = vmul.f32 %v86_v0, %v208_v10 }
  0x9c   :  { %v110_v8 = vor.u32 1.1754944e-38, %v109_v63  ;;  %vm108_vm7 = vcmp.eq.f32.partialorder %v107_v2, 8.507059e+37 }
  0x9f   :  { %v143_v51 = vpop.eup %142 }
  0xa0   :  { %v145_v53 = vpop.eup %144  ;;  %v59_v54 = vmul.f32 %v143_v51, %v57_v46  ;;  %vm64_vm0 = vweird.f32 %v143_v51 }
  0xa1   :  { %v99_v56 = vmul.f32 %v145_v53, %v97_v47  ;;  %vm104_vm1 = vweird.f32 %v145_v53  ;;  %vm65_vm3 = vmor %vm63_vm2, %vm64_vm0 }
  0xa2   :  { %v60_v57 = vsub.f32 1.0, %v59_v54  ;;  %vm105_vm6 = vmor %vm103_vm4, %vm104_vm1 }
  0xa3   :  { %v100_v60 = vsub.f32 1.0, %v99_v56 }
  0xa4   :  { %v61_v61 = vmul.f32 %v143_v51, %v60_v57 }
  0xa5   :  { %v101_v1 = vmul.f32 %v145_v53, %v100_v60 }
  0xa6   :  { %v62_v3 = vadd.f32 %v143_v51, %v61_v61 }
  0xa7   :  { %v102_v5 = vadd.f32 %v145_v53, %v101_v1 }
  0xa8   :  { %v66_v7 = vsel %vm65_vm3, %v143_v51, %v62_v3 }
  0xa9   :  { %v71_v11 = vsel %vm68_vm5, %v70_v4, %v66_v7  ;;  %v106_v13 = vsel %vm105_vm6, %v145_v53, %v102_v5 }
  0xaa   :  { %v72_v14 = vmul.f32 %v71_v11, %v47_v6  ;;  %v111_v15 = vsel %vm108_vm7, %v110_v8, %v106_v13 }
  0xab   :  { %v112_v16 = vmul.f32 %v111_v15, %v87_v12 }
  0xac   :  { %v137_v17 = vclamps-f32 %v72_v14, 1.0 }
  0xad   :  { %v138_v18 = vclamps-f32 %v112_v16, 1.0 }
  0xae   :  { %v115_v20 = vadd.f32 1.0, %v137_v17 }
  0xaf   :  { %v116_v22 = vadd.f32 1.0, %v138_v18 }
  0xb0   :  { %v117_v23 = vmul.f32 %v115_v20, %v33_v19 }
  0xb1   :  { %v118_v24 = vmul.f32 %v116_v22, %v34_v21 }
  0xb2   :  { %119 = vst [vmem:[#allocation2] sm:$0xff] %v117_v23 }
  0xb3   :  { %120 = vst [vmem:[#allocation2 + $0x8] sm:$0xff] %v118_v24 }
  0xb4   :  { %131 = dma.vmem_to_hbm [thread:$0]  %s127_s1, 256, %s129_s21, [#allocation3]  }
  0xb5   :  { %170 = dma.done.wait [#allocation3], 256  }
  0xb6   :  { %171 = vsyncadd [#allocation3], 4294967040 }
  0xb7   :  { %136 = vsyncpa [#allocation3], 1 }

</bundles_post_ra>
